<compile_context>
chip_gen: v7x
topology: tpu7x:2x2x1
jax: 0.10.0
libtpu: 0.0.40
codegen_flags: <defaults>
</compile_context>

<pallas_src>
import jax
import jax.numpy as jnp
from jax.experimental import pallas as pl
from jax.experimental.pallas import tpu as pltpu


def _rezero_fn_kernel(g_ref, x_ref, w_ref, b_ref, out_ref, aux_ref):
    """fn(x) = (x @ W + b, row_sum(x)); Rezero scales only the first output by g."""
    x = x_ref[...]
    # MXU matmul, f32 accumulation; bias broadcast happens once per output tile.
    y = jnp.dot(x, w_ref[...], preferred_element_type=jnp.float32)
    y = y + b_ref[...].astype(jnp.float32)
    g = g_ref[0]  # scalar Rezero gate (SMEM)
    out_ref[...] = (y * g).astype(out_ref.dtype)
    # *rest: aux row-sums of the input, NOT scaled by g.  Stored lane-dense:
    # one (1, tm) row per grid tile (avoids width-1 masked stores).
    # Note: aux is returned in f32 regardless of activation dtype.
    row_sum = jnp.sum(x.astype(jnp.float32), axis=-1)
    aux_ref[...] = row_sum[None, :].astype(aux_ref.dtype)


def rezero_forward(x, w, b, g, *, tm=256):
    """Rezero(fn)(x) where fn(x) = (x @ w + b, row_sum(x)).

    Returns (y * g) of shape (B, S, H) and aux row-sums of shape (B, S).
    """
    B, S, H = x.shape
    M = B * S
    x2 = x.reshape(M, H)

    if M <= tm:
        # Single full-extent block: exempt from the (8,128) divisibility rule.
        tm_eff, grid_m = M, 1
    else:
        # 128-aligned row tile: satisfies the (8,128) rule for both the
        # (tm_eff, H) out block (sublane dim, needs %8) and the (1, tm_eff)
        # aux block (lane dim, needs %128).  The boundary block (M % tm_eff)
        # is clipped by Pallas on writeback -- no host-side pad / slice.
        tm_eff = max(128, (tm // 128) * 128)
        grid_m = pl.cdiv(M, tm_eff)

    x_item = jnp.dtype(x.dtype).itemsize
    w_item = jnp.dtype(w.dtype).itemsize
    b_item = jnp.dtype(b.dtype).itemsize

    # Explicit scoped-VMEM budget: double-buffered x/out tiles, single-buffered
    # resident W/b, double-buffered aux tile, plus slack for internal scratch.
    needed = (2 * tm_eff * H * x_item            # x tiles
              + 2 * tm_eff * H * x_item          # out tiles
              + H * H * w_item                   # W (Buffered(1))
              + H * b_item                       # b (Buffered(1))
              + 2 * tm_eff * 4                   # aux tiles (f32)
              + (4 << 20))                       # slack
    vmem_limit = int(min(max(needed, 16 << 20), 100 << 20))

    cost = pl.CostEstimate(
        flops=2 * M * H * H,
        bytes_accessed=x_item * (2 * M * H) + w_item * H * H + b_item * H + 4 * M,
        transcendentals=0,
    )

    out, aux = pl.pallas_call(
        _rezero_fn_kernel,
        out_shape=(
            jax.ShapeDtypeStruct((M, H), x.dtype),     # y * g
            jax.ShapeDtypeStruct((1, M), jnp.float32), # aux (lane-dense slab)
        ),
        grid=(grid_m,),
        in_specs=[
            pl.BlockSpec(memory_space=pltpu.SMEM),               # g (scalar gate)
            pl.BlockSpec((tm_eff, H), lambda i: (i, 0)),          # x row-tile
            pl.BlockSpec((H, H), lambda i: (0, 0),
                         pipeline_mode=pl.Buffered(1)),           # W, resident
            pl.BlockSpec((1, H), lambda i: (0, 0),
                         pipeline_mode=pl.Buffered(1)),           # b, resident
        ],
        out_specs=(
            pl.BlockSpec((tm_eff, H), lambda i: (i, 0)),          # out row-tile
            pl.BlockSpec((1, tm_eff), lambda i: (0, i)),          # aux lane-dense
        ),
        compiler_params=pltpu.CompilerParams(
            dimension_semantics=("parallel",),  # megacore sharding on v7x
            vmem_limit_bytes=vmem_limit,
        ),
        cost_estimate=cost,
    )(g, x2, w, b)

    return out.reshape(B, S, H), aux[0].reshape(B, S)


def _reference(x, w, b, g):
    B, S, H = x.shape
    x2 = x.reshape(B * S, H)
    y = (x2 @ w + b) * g[0]
    return y.reshape(B, S, H), x2.sum(axis=-1).reshape(B, S)


if __name__ == "__main__":
    key = jax.random.PRNGKey(0)
    kx, kw, kb, kx2, kw2, kb2 = jax.random.split(key, 6)

    # --- Test 1: small shapes, single-tile path, gate = 0 (PyTorch init) ---
    B, S, H = 2, 8, 32
    x = jax.random.normal(kx, (B, S, H), dtype=jnp.float32)
    w = jax.random.normal(kw, (H, H), dtype=jnp.float32) / jnp.sqrt(H)
    b = jax.random.normal(kb, (1, H), dtype=jnp.float32) * 0.1
    g = jnp.zeros((1,), dtype=jnp.float32)  # nn.Parameter(torch.zeros(1))

    out, aux = rezero_forward(x, w, b, g)
    out = jax.block_until_ready(out)
    aux = jax.block_until_ready(aux)
    ref_out, ref_aux = _reference(x, w, b, g)
    assert jnp.allclose(out, ref_out, atol=1e-5), "output mismatch (g=0)"
    assert jnp.allclose(aux, ref_aux, atol=1e-4), "aux mismatch (g=0)"

    # Non-zero gate, same kernel.
    g1 = jnp.array([0.5], dtype=jnp.float32)
    out1, aux1 = rezero_forward(x, w, b, g1)
    out1 = jax.block_until_ready(out1)
    ref_out1, ref_aux1 = _reference(x, w, b, g1)
    assert jnp.allclose(out1, ref_out1, atol=1e-5), "output mismatch (g=0.5)"
    assert jnp.allclose(aux1, ref_aux1, atol=1e-4), "aux mismatch (g=0.5)"

    # --- Test 2: gridded path with a partial boundary block (no host pad) ---
    # M = 1000, tm=256 -> grid of 4, last block has only 232 valid rows;
    # also exercises aux boundary clipping on the lane dim (1000 % 128 != 0).
    B2, S2, H2 = 2, 500, 128
    xg = jax.random.normal(kx2, (B2, S2, H2), dtype=jnp.float32)
    wg = jax.random.normal(kw2, (H2, H2), dtype=jnp.float32) / jnp.sqrt(H2)
    bg = jax.random.normal(kb2, (1, H2), dtype=jnp.float32) * 0.1
    gg = jnp.array([0.25], dtype=jnp.float32)

    out2, aux2 = rezero_forward(xg, wg, bg, gg, tm=256)
    out2 = jax.block_until_ready(out2)
    aux2 = jax.block_until_ready(aux2)
    ref_out2, ref_aux2 = _reference(xg, wg, bg, gg)
    assert jnp.allclose(out2, ref_out2, atol=1e-4, rtol=1e-4), "gridded output mismatch"
    assert jnp.allclose(aux2, ref_aux2, atol=1e-3, rtol=1e-4), "gridded aux mismatch"

    print("KERNEL_OK")
</pallas_src>

<mosaic_0001>
module attributes {stable_mosaic.version = 11 : i64} {
  func.func @_rezero_fn_kernel(%arg0: i32, %arg1: memref<1xf32, #tpu.memory_space<smem>>, %arg2: memref<16x32xf32, #tpu.memory_space<vmem>>, %arg3: memref<32x32xf32, #tpu.memory_space<vmem>>, %arg4: memref<1x32xf32, #tpu.memory_space<vmem>>, %arg5: memref<16x32xf32, #tpu.memory_space<vmem>>, %arg6: memref<1x16xf32, #tpu.memory_space<vmem>>) attributes {dimension_semantics = [#tpu.dimension_semantics<parallel>], iteration_bounds = array<i64: 1>, scalar_prefetch = 0 : i64, scratch_operands = 0 : i64, tpu.core_type = #tpu.core_type<tc>, window_params = [{transform_indices = @transform_0, window_bounds = array<i64: 1>}, {transform_indices = @transform_1, window_bounds = array<i64: 16, 32>}, {pipeline_mode = #tpu.pipeline_mode<synchronous>, transform_indices = @transform_2, window_bounds = array<i64: 32, 32>}, {pipeline_mode = #tpu.pipeline_mode<synchronous>, transform_indices = @transform_3, window_bounds = array<i64: 1, 32>}, {transform_indices = @transform_4, window_bounds = array<i64: 16, 32>}, {transform_indices = @transform_5, window_bounds = array<i64: 1, 16>}]} {
    %c0 = arith.constant 0 : index
    %c0_0 = arith.constant 0 : index
    %0 = vector.load %arg2[%c0, %c0_0] : memref<16x32xf32, #tpu.memory_space<vmem>>, vector<16x32xf32>
    %c0_1 = arith.constant 0 : index
    %c0_2 = arith.constant 0 : index
    %1 = vector.load %arg3[%c0_1, %c0_2] : memref<32x32xf32, #tpu.memory_space<vmem>>, vector<32x32xf32>
    %cst = arith.constant dense<0.000000e+00> : vector<16x32xf32>
    %2 = tpu.matmul %0, %1, %cst {dimension_numbers = #tpu.dot_dimension_numbers<[1], [0], [0], [1], [0, 0, 1, 1], [], []>} : vector<16x32xf32>, vector<32x32xf32>, vector<16x32xf32> -> vector<16x32xf32>
    %c0_3 = arith.constant 0 : index
    %c0_4 = arith.constant 0 : index
    %3 = vector.load %arg4[%c0_3, %c0_4] : memref<1x32xf32, #tpu.memory_space<vmem>>, vector<1x32xf32>
    %4 = vector.broadcast %3 : vector<1x32xf32> to vector<16x32xf32>
    %5 = arith.addf %2, %4 : vector<16x32xf32>
    %c0_5 = arith.constant 0 : index
    %6 = memref.load %arg1[%c0_5] : memref<1xf32, #tpu.memory_space<smem>>
    %7 = vector.broadcast %6 : f32 to vector<16x32xf32>
    %8 = arith.mulf %5, %7 : vector<16x32xf32>
    %c0_6 = arith.constant 0 : index
    %c0_7 = arith.constant 0 : index
    %9 = vector.load %arg5[%c0_6, %c0_7] : memref<16x32xf32, #tpu.memory_space<vmem>>, vector<16x32xf32>
    tpu.vector_store %arg5[%c0_6, %c0_7], %8 {strides = array<i32>} : memref<16x32xf32, #tpu.memory_space<vmem>>, vector<16x32xf32>,
    %cst_8 = arith.constant dense<0.000000e+00> : vector<16xf32>
    %10 = vector.multi_reduction <add>, %0, %cst_8 [1] : vector<16x32xf32> to vector<16xf32>
    %11 = vector.shape_cast %10 : vector<16xf32> to vector<1x16xf32>
    %c0_9 = arith.constant 0 : index
    %c0_10 = arith.constant 0 : index
    %12 = vector.load %arg6[%c0_9, %c0_10] : memref<1x16xf32, #tpu.memory_space<vmem>>, vector<1x16xf32>
    tpu.vector_store %arg6[%c0_9, %c0_10], %11 {strides = array<i32>} : memref<1x16xf32, #tpu.memory_space<vmem>>, vector<1x16xf32>,
    return
  }
  func.func @transform_0(%arg0: i32) -> i32 {
    %c0_i32 = arith.constant 0 : i32
    %c0_i32_0 = arith.constant 0 : i32
    return %c0_i32 : i32
  }
  func.func @transform_1(%arg0: i32) -> (i32, i32) {
    %c0_i32 = arith.constant 0 : i32
    %c0_i32_0 = arith.constant 0 : i32
    return %arg0, %c0_i32 : i32, i32
  }
  func.func @transform_2(%arg0: i32) -> (i32, i32) {
    %c0_i32 = arith.constant 0 : i32
    %c0_i32_0 = arith.constant 0 : i32
    %c0_i32_1 = arith.constant 0 : i32
    return %c0_i32, %c0_i32_0 : i32, i32
  }
  func.func @transform_3(%arg0: i32) -> (i32, i32) {
    %c0_i32 = arith.constant 0 : i32
    %c0_i32_0 = arith.constant 0 : i32
    %c0_i32_1 = arith.constant 0 : i32
    return %c0_i32, %c0_i32_0 : i32, i32
  }
  func.func @transform_4(%arg0: i32) -> (i32, i32) {
    %c0_i32 = arith.constant 0 : i32
    %c0_i32_0 = arith.constant 0 : i32
    return %arg0, %c0_i32 : i32, i32
  }
  func.func @transform_5(%arg0: i32) -> (i32, i32) {
    %c0_i32 = arith.constant 0 : i32
    %c0_i32_0 = arith.constant 0 : i32
    return %c0_i32, %arg0 : i32, i32
  }
}

</mosaic_0001>

<bundles_post_ra>
// kernel: tpu_custom_call.1
= control target key start
LH: loop header
LB: loop body
LE: loop exit
PB: predicated region body
PF: predicated region fallthrough
CT: control target
= control target key end

     0   :  { %12 = vsyncpa [#allocation4], 0  ;;  %s442_s0 = inlined_call_operand.<no memory space> [shape: f32[1], index: 0, kind: input, shape index: {}]   ;;  %s443_s1 = inlined_call_operand.hbm [shape: f32[16,32], index: 1, kind: input, shape index: {}]   ;;  %s444_s2 = inlined_call_operand.hbm [shape: f32[32,32], index: 2, kind: input, shape index: {}]   ;;  %s445_s3 = inlined_call_operand.vmem [shape: f32[1,32], index: 3, kind: input, shape index: {}]   ;;  %s446_s4 = inlined_call_operand.hbm [shape: f32[16,32], index: 4, kind: output, shape index: {0}]   ;;  %s447_s5 = inlined_call_operand.hbm [shape: f32[1,16], index: 5, kind: output, shape index: {1}]  }
   0x1   :  { %13 = vsyncpa [#allocation7], 0 }
   0x2   :  { %14 = vsyncpa [#allocation5], 0 }
   0x3   :  { %15 = vsyncpa [#allocation10], 0  ;;  %s337_s18 = smov [#allocation3]   ;;  %s241_s22 = scalar_lea.hbm %s443_s1, 256 }
   0x4   :  { %s23_s19 = sshll.u32 %s337_s18, 4  ;;  %p242_p0 = scmp.ne.s32.totalorder %s443_s1, %s241_s22  ;;  %s24_s19 = int_to_ptr.vmem [resolvable:$true] %s23_s19 }
   0x5   :  { %p245_p1 = scmp.lt.u32.totalorder %s241_s22, %s443_s1 }
   0x7   :  { %p247_p2 = pnand %p245_p1, %p242_p0 }
   0x9   :  { %250 = shalt.err (!%p247_p2)
}
   0xa   :  { %s251_s27 = scalar_lea.vmem %s24_s19, 256  ;;  %p256_p4 = scmp.lt.s32.totalorder %s24_s19, %s24_s19 }
   0xb   :  { %p252_p3 = scmp.ne.s32.totalorder %s24_s19, %s251_s27  ;;  %p257_p5 = scmp.lt.s32.totalorder %s251_s27, %s251_s27 }
   0xd   :  { %p258_p6 = por %p257_p5, %p256_p4 }
   0xf   :  { %p259_p7 = pnand %p258_p6, %p252_p3 }
  0x11   :  { %262 = shalt.err (!%p259_p7)
}
  0x12   :  { %s338_s28 = smov 128   ;;  %s339_s29 = smov 8  }
  0x13   :  { %29 = dma.hbm_to_vmem [thread:$0]  %s443_s1, 256, %s24_s19, [#allocation4], %s338_s28, %s338_s28, %s339_s29  }
  0x14   :  { %s340_s7 = smov [#allocation6]   ;;  %s263_s11 = scalar_lea.hbm %s444_s2, 512 }
  0x15   :  { %s35_s8 = sshll.u32 %s340_s7, 4  ;;  %p264_p8 = scmp.ne.s32.totalorder %s444_s2, %s263_s11  ;;  %s36_s8 = int_to_ptr.vmem [resolvable:$true] %s35_s8 }
  0x16   :  { %p267_p9 = scmp.lt.u32.totalorder %s263_s11, %s444_s2 }
  0x18   :  { %p269_p10 = pnand %p267_p9, %p264_p8 }
  0x1a   :  { %272 = shalt.err (!%p269_p10)
}
  0x1b   :  { %s273_s16 = scalar_lea.vmem %s36_s8, 512  ;;  %p278_p12 = scmp.lt.s32.totalorder %s36_s8, %s36_s8 }
  0x1c   :  { %p274_p11 = scmp.ne.s32.totalorder %s36_s8, %s273_s16  ;;  %p279_p13 = scmp.lt.s32.totalorder %s273_s16, %s273_s16 }
  0x1e   :  { %p280_p0 = por %p279_p13, %p278_p12 }
  0x20   :  { %p281_p1 = pnand %p280_p0, %p274_p11 }
  0x22   :  { %284 = shalt.err (!%p281_p1)
}
  0x23   :  { %41 = dma.hbm_to_vmem [thread:$0]  %s444_s2, 512, %s36_s8, [#allocation7], %s338_s28, %s338_s28, %s339_s29  }
  0x24   :  { %329 = dma.done.wait [#allocation4], 256  }
  0x25   :  { %330 = vsyncadd [#allocation4], 4294967040 }
  0x26   :  { %331 = dma.done.wait [#allocation7], 512  }
  0x27   :  { %332 = vsyncadd [#allocation7], 4294966784  ;;  %vm63_vm0 = vcmask 261120   ;;  %v52_v0 = vld [vmem:[#allocation6] sm:$0xff]  ;;  %v53_v1 = vld [vmem:[#allocation6 + $0x8] sm:$0xff]  ;;  %v159_v10 = vlaneseq  ;;  %s341_s2 = smov [#allocation9]  }
  0x28   :  { %v54_v2 = vld [vmem:[#allocation6 + $0x10] sm:$0xff]  ;;  %v227_v3 = vpack.c.bf16 %v53_v1, %v52_v0  ;;  %v55_v4 = vld [vmem:[#allocation6 + $0x18] sm:$0xff]  ;;  %s193_s18 = sshll.u32 %s341_s2, 4  ;;  %vm170_vm1 = vcmask 130112   ;;  %vm173_vm2 = vcmask 122880   ;;  %s194_s18 = int_to_ptr.vmem [resolvable:$true] %s193_s18 }
  0x29   :  { %v50_v5 = vld [vmem:[#allocation3] sm:$0xff]  ;;  %v231_v6 = vpack.c.bf16 %v55_v4, %v54_v2  ;;  %v51_v8 = vld [vmem:[#allocation3 + $0x8] sm:$0xff]  ;;  %v160_v11 = vand.u32 127, %v159_v10  ;;  %v162_v12 = vshrl.u32 %v159_v10, 7  ;;  %s285_s19 = scalar_lea.vmem %s194_s18, 16  ;;  %s289_s20 = scalar_lea.vmem %s194_s18, 32 }
  0x2a   :  { %224 = vmatprep.mubr.msk.f32.mxu0 %vm63_vm0, %v50_v5  ;;  %v151_v7 = vsel %vm63_vm0, %v50_v5, 0.0  ;;  %228 = vmatprep.subr.bf16.mxu0 %v227_v3  ;;  %v154_v9 = vsel %vm63_vm0, %v51_v8, 0.0  ;;  %p286_p2 = scmp.ne.s32.totalorder %s194_s18, %s285_s19  ;;  %p290_p3 = scmp.lt.s32.totalorder %s194_s18, %s194_s18 }
  0x2b   :  { %152 = vadd.xlane.f32.xlu0 %v151_v7  ;;  %230 = vmatpush3.bf16.msra.mxu0 %v227_v3  ;;  %v165_v13 = vadd.s32 4294967288, %v160_v11  ;;  %v163_v14 = vsub.s32 %v160_v11, %v162_v12  ;;  %p291_p4 = scmp.lt.s32.totalorder %s289_s20, %s285_s19 }
  0x2c   :  { %232 = vmatprep.subr.bf16.mxu0 %v231_v6 }
  0x2d   :  { %v168_v16 = vsub.s32 %v165_v13, %v162_v12  ;;  %p292_p5 = por %p291_p4, %p290_p3 }
  0x2f   :  { %155 = vadd.xlane.f32.xlu0 %v154_v9  ;;  %234 = vmatpush3.bf16.msra.mxu0 %v231_v6  ;;  %p293_p6 = pnand %p292_p5, %p286_p2 }
  0x32   :  { %225 = vmatmul.mubr.msk.f32.vlgmr.msra.gmra.mrb[0].mxu0 %vm63_vm0, %v51_v8 }
  0xb8   :  { %v153_v15 = vpop.xlane.xlu0 %152 }
  0xb9   :  { %v164_v17 = vrot.slane %v153_v15, %v163_v14 }
  0xbc   :  { %v156_v18 = vpop.xlane.xlu0 %155 }
  0xbd   :  { %v169_v19 = vrot.slane %v156_v18, %v168_v16 }
  0xbf   :  { %v171_v20 = vsel %vm170_vm1, %v169_v19, %v164_v17 }
  0xc0   :  { %174 = vst.msk [vmem:[#allocation9] sm:$0x1] %vm173_vm2, %v171_v20 }
  0xc1   :  { %296 = shalt.err (!%p293_p6)
}
  0xc2   :  { %s297_s23 = scalar_lea.hbm %s447_s5, 16 }
  0xc3   :  { %p298_p7 = scmp.ne.s32.totalorder %s447_s5, %s297_s23  ;;  %p301_p8 = scmp.lt.u32.totalorder %s297_s23, %s447_s5 }
  0xc5   :  { %p303_p9 = pnand %p301_p8, %p298_p7 }
  0xc7   :  { %306 = shalt.err (!%p303_p9)
}
  0xc8   :  { %196 = dma.vmem_to_hbm [thread:$0]  %s194_s18, 16, %s447_s5, [#allocation10]   ;;  %v207_v21 = vld [vmem:[%s445_s3] ss:$0 sm:$0xff]  ;;  %v146_v23 = vstv %s442_s0 }
  0xc9   :  { %s342_s11 = smov [#allocation8]  }
  0xca   :  { %s180_s12 = sshll.u32 %s342_s11, 4  ;;  %s181_s12 = int_to_ptr.vmem [resolvable:$true] %s180_s12 }
  0xcb   :  { %s307_s5 = scalar_lea.vmem %s181_s12, 256  ;;  %p312_p11 = scmp.lt.s32.totalorder %s181_s12, %s181_s12 }
  0xcc   :  { %p308_p10 = scmp.ne.s32.totalorder %s181_s12, %s307_s5  ;;  %p313_p12 = scmp.lt.s32.totalorder %s307_s5, %s307_s5 }
  0xce   :  { %p314_p13 = por %p313_p12, %p312_p11 }
  0xd0   :  { %p315_p0 = pnand %p314_p13, %p308_p10 }
 0x105   :  { %v226_v22 = vpop.f32.mrb[0].mxu0 }
 0x106   :  { %v142_v24 = vadd.f32 %v226_v22, %v207_v21  ;;  %v136_v25 = vpop.f32.mrb[1].mxu0 }
 0x107   :  { %v137_v26 = vadd.f32 %v207_v21, %v136_v25 }
 0x108   :  { %v148_v27 = vmul.f32 %v146_v23, %v142_v24 }
 0x109   :  { %v147_v28 = vmul.f32 %v146_v23, %v137_v26 }
 0x10a   :  { %150 = vst.msk [vmem:[#allocation8 + $0x8] sm:$0xff] %vm63_vm0, %v148_v27 }
 0x10b   :  { %149 = vst.msk [vmem:[#allocation8] sm:$0xff] %vm63_vm0, %v147_v28 }
 0x10c   :  { %318 = shalt.err (!%p315_p0)
}
 0x10d   :  { %s319_s13 = scalar_lea.hbm %s446_s4, 256 }
 0x10e   :  { %p320_p1 = scmp.ne.s32.totalorder %s446_s4, %s319_s13  ;;  %p323_p2 = scmp.lt.u32.totalorder %s319_s13, %s446_s4 }
 0x110   :  { %p325_p3 = pnand %p323_p2, %p320_p1 }
 0x112   :  { %328 = shalt.err (!%p325_p3)
}
 0x113   :  { %186 = dma.vmem_to_hbm [thread:$0]  %s181_s12, 256, %s446_s4, [#allocation5], %s338_s28, %s338_s28, %s339_s29  }
 0x114   :  { %333 = dma.done.wait [#allocation5], 256  }
 0x115   :  { %334 = vsyncadd [#allocation5], 4294967040 }
 0x116   :  { %335 = dma.done.wait [#allocation10], 16  }
 0x117   :  { %336 = vsyncadd [#allocation10], 4294967280 }
 0x118   :  { %203 = vsyncpa [#allocation4], 1 }
 0x119   :  { %204 = vsyncpa [#allocation7], 1 }
 0x11a   :  { %205 = vsyncpa [#allocation5], 1 }
 0x11b   :  { %206 = vsyncpa [#allocation10], 1 }

</bundles_post_ra>
